<compile_context>
chip_gen: v7x
topology: tpu7x:2x2x1
jax: 0.10.0
libtpu: 0.0.40
codegen_flags: <defaults>
</compile_context>

<pallas_src>
import math
import functools
import numpy as np
import jax
import jax.numpy as jnp
from jax import lax
from jax.experimental import pallas as pl
from jax.experimental.pallas import tpu as pltpu


def _hybrid_kernel(xc_ref, xs_ref, mask_ref, wcf_ref, bias_ref, abw_ref, g2_ref,
                   out_ref, *, kernel_size, padding):
    """One grid step = `Bt` samples: conv + separable DFT + 1x1 mix + add, fused."""
    _, bt, c_out, hw = out_ref.shape          # (1, Bt, C_out, H*W)
    w = xs_ref.shape[2]                       # W
    h = hw // w                               # H
    ch = xs_ref.shape[1] // bt                # C_in * H
    n = xc_ref.shape[2]                       # Bt * H * W

    # --------- conv branch: build the 3x3 patches in-kernel (no im2col in HBM) ---------
    xc = xc_ref[0].astype(jnp.float32)        # (C_in, Bt*HW); masking kept in f32 (v5e-safe)
    masks = mask_ref[...]                     # (K*K, Bt*HW) f32 in {0, 1}

    pieces = []
    k = 0
    for kh in range(kernel_size):
        for kw in range(kernel_size):
            s = (kh - padding) * w + (kw - padding)
            if s == 0:
                shifted = xc
            else:
                i = s % n                     # left-rotate: shifted[:, p] == xc[:, (p + s) % n]
                shifted = jnp.concatenate([xc[:, i:], xc[:, :i]], axis=1)
            pieces.append(shifted * masks[k:k + 1, :])
            k += 1
    conv_rhs = jnp.concatenate(pieces, axis=0).astype(jnp.bfloat16)      # (K*K*C_in, Bt*HW)
    conv = (jnp.dot(wcf_ref[...], conv_rhs, preferred_element_type=jnp.float32)
            + bias_ref[...])                                             # (C_out, Bt*HW) f32

    # --------- spectral branch: separable DFT fused with the 1x1 channel mix ---------
    # Stage 1: W-axis DFT with batch folded into the rows.
    y = jnp.dot(xs_ref[0], abw_ref[...],
                preferred_element_type=jnp.float32)                      # (Bt*C_in*H, 2W)
    # Stage 2 RHS: per-sample [real; imag] stack, batch folded into the columns.
    cols = []
    for b in range(bt):
        yb = y[b * ch:(b + 1) * ch, :]
        cols.append(jnp.concatenate([yb[:, :w], yb[:, w:]], axis=0))     # (2*C_in*H, W)
    rhs = jnp.concatenate(cols, axis=1).astype(jnp.bfloat16)             # (2*C_in*H, Bt*W)
    # Stage 2: H-axis DFT + 1x1 mix in a single matmul (K = 2*C_in*H).
    spec = jnp.dot(g2_ref[...], rhs,
                   preferred_element_type=jnp.float32)                   # (H*C_out, Bt*W)

    # --------- fuse branches; emit one lane-dense (C_out, HW) tile per sample ---------
    for b in range(bt):
        conv_b = conv[:, b * hw:(b + 1) * hw]                            # (C_out, HW)
        sp = [spec[hh * c_out:(hh + 1) * c_out, b * w:(b + 1) * w] for hh in range(h)]
        spec_b = jnp.concatenate(sp, axis=1)                             # (C_out, HW) lane-dense
        out_ref[0, b] = (conv_b + spec_b).astype(out_ref.dtype)


def _dft_axis_matrices(n):
    """Cos / -Sin matrices of the length-n forward DFT, angles modular-reduced."""
    k = np.arange(n)
    prod = np.outer(k, k) % n
    ang = 2.0 * np.pi * prod.astype(np.float64) / n
    return np.cos(ang), -np.sin(ang)


def _padded_bytes(shape, itemsize):
    rows = 1
    for d in shape[:-1]:
        rows *= int(d)
    cols = int(shape[-1])
    return (-(-rows // 8) * 8) * (-(-cols // 128) * 128) * itemsize


def make_discrete_fourier_2d_conv_block_hybrid(wconv, bconv, w1, b1, *,
                                               height, width,
                                               kernel_size=3, padding=1):
    """Precompute all constants once; return a jitted forward(x) closure."""
    C_out, C_in, K, _ = wconv.shape
    assert 2 * padding == kernel_size - 1, "stride-1, 'same' spatial size assumed"
    H, W = height, width
    HW = H * W
    KK = K * K

    wconv_np = np.asarray(wconv, dtype=np.float64)
    bconv_np = np.asarray(bconv, dtype=np.float64)
    w1_np = np.asarray(w1, dtype=np.float64)
    b1_np = np.asarray(b1, dtype=np.float64)

    # 1x1 weight split mirrors cat((conv_out, spec_real, spec_imag), dim=1).
    w1c = w1_np[:, :C_out]
    w1r = w1_np[:, C_out:C_out + C_in]
    w1i = w1_np[:, C_out + C_in:]

    # Conv weight with the 1x1 conv slice folded in; columns ordered (kh, kw, c)
    # to match the in-kernel shifted-patch row order.
    wperm = wconv_np.transpose(0, 2, 3, 1).reshape(C_out, KK * C_in)
    wcf = jnp.asarray(w1c @ wperm, jnp.bfloat16)                          # (C_out, K*K*C_in)
    bias = jnp.asarray((w1c @ bconv_np + b1_np).reshape(C_out, 1), jnp.float32)

    # Separable DFT constants (float64 numpy, cast once).
    a_h, b_h = _dft_axis_matrices(H)
    a_w, b_w = _dft_axis_matrices(W)
    abw = jnp.asarray(np.concatenate([a_w, b_w], axis=1), jnp.bfloat16)   # (W, 2W)

    # H-axis DFT fused with the 1x1 channel mix; rows ordered (h', o) so the
    # kernel can relayout (h',o)-rows -> HW-lanes with plain slices + concats.
    g2r = (np.einsum('oc,hp->poch', w1r, a_h) +
           np.einsum('oc,hp->poch', w1i, b_h)).reshape(H * C_out, C_in * H)
    g2i = (np.einsum('oc,hp->poch', w1i, a_h) -
           np.einsum('oc,hp->poch', w1r, b_h)).reshape(H * C_out, C_in * H)
    g2 = jnp.asarray(np.concatenate([g2r, g2i], axis=1), jnp.bfloat16)    # (H*C_out, 2*C_in*H)

    # Zero-padding masks for the in-kernel shifted patches, one row per (kh, kw).
    hh = np.arange(H)[:, None]
    ww = np.arange(W)[None, :]
    mrows = []
    for kh in range(K):
        for kw in range(K):
            dh, dw = kh - padding, kw - padding
            m = ((hh + dh >= 0) & (hh + dh < H) &
                 (ww + dw >= 0) & (ww + dw < W)).astype(np.float32)
            mrows.append(m.reshape(HW))
    masks_np = np.stack(mrows, axis=0)                                    # (K*K, HW)

    kernel = functools.partial(_hybrid_kernel, kernel_size=K, padding=padding)

    @jax.jit
    def forward(x):
        B = x.shape[0]
        bt = min(B, 8)
        while B % bt:
            bt -= 1
        nsteps = B // bt

        xb = x.astype(jnp.bfloat16)
        # Conv layout: rows = C_in, columns = (b-within-step, h, w)  -> lane-dense N.
        xc = (xb.reshape(nsteps, bt, C_in, HW)
                .transpose(0, 2, 1, 3)
                .reshape(nsteps, C_in, bt * HW))
        # Spectral layout: rows = (b-within-step, c, h), columns = w.
        xs = xb.reshape(nsteps, bt * C_in * H, W)
        masks = jnp.asarray(np.tile(masks_np, (1, bt)), jnp.float32)      # (K*K, bt*HW)

        # VMEM budget: grid-varying blocks double-buffered, constants once, 48 MiB cap.
        var_blocks = [((C_in, bt * HW), 2), ((bt * C_in * H, W), 2), ((bt * C_out, HW), 4)]
        const_blocks = [((KK, bt * HW), 4), ((C_out, KK * C_in), 2), ((C_out, 1), 4),
                        ((W, 2 * W), 2), ((H * C_out, 2 * C_in * H), 2)]
        footprint = (2 * sum(_padded_bytes(s, it) for s, it in var_blocks)
                     + sum(_padded_bytes(s, it) for s, it in const_blocks))
        vmem_limit = int(min(max(4 * footprint + (4 << 20), 16 << 20), 48 << 20))

        flops = 2 * B * (C_out * KK * C_in * HW                 # conv branch
                         + (C_in * H) * W * (2 * W)             # W-axis DFT
                         + (H * C_out) * (2 * C_in * H) * W)    # H-axis DFT + 1x1 mix
        bytes_accessed = (2 * 2 * B * C_in * HW                 # two bf16 views of x
                          + 4 * B * C_out * HW                  # f32 output
                          + 2 * (C_out * KK * C_in + 2 * W * W + H * C_out * 2 * C_in * H)
                          + 4 * (KK * bt * HW + C_out))

        out = pl.pallas_call(
            kernel,
            out_shape=jax.ShapeDtypeStruct((nsteps, bt, C_out, HW), jnp.float32),
            grid=(nsteps,),
            in_specs=[
                pl.BlockSpec((1, C_in, bt * HW), lambda i: (i, 0, 0)),           # x (conv layout)
                pl.BlockSpec((1, bt * C_in * H, W), lambda i: (i, 0, 0)),        # x (DFT layout)
                pl.BlockSpec((KK, bt * HW), lambda i: (0, 0)),                   # padding masks
                pl.BlockSpec((C_out, KK * C_in), lambda i: (0, 0)),              # fused conv weight
                pl.BlockSpec((C_out, 1), lambda i: (0, 0)),                      # fused bias
                pl.BlockSpec((W, 2 * W), lambda i: (0, 0)),                      # [cos | -sin] W-axis
                pl.BlockSpec((H * C_out, 2 * C_in * H), lambda i: (0, 0)),       # fused H-axis + mix
            ],
            out_specs=pl.BlockSpec((1, bt, C_out, HW), lambda i: (i, 0, 0, 0)),
            compiler_params=pltpu.CompilerParams(
                dimension_semantics=("parallel",),
                vmem_limit_bytes=vmem_limit),
            cost_estimate=pl.CostEstimate(flops=int(flops), transcendentals=0,
                                          bytes_accessed=int(bytes_accessed)),
        )(xc, xs, masks, wcf, bias, abw, g2)

        return out.reshape(B, C_out, H, W)

    return forward


def _reference(x, wconv, bconv, w1, b1, padding=1):
    hp = lax.Precision.HIGHEST
    conv_out = lax.conv_general_dilated(
        x, wconv, window_strides=(1, 1),
        padding=((padding, padding), (padding, padding)),
        dimension_numbers=('NCHW', 'OIHW', 'NCHW'),
        precision=hp) + bconv[None, :, None, None]
    f = jnp.fft.fft2(x)
    spec = jnp.concatenate([f.real, f.imag], axis=1).astype(jnp.float32)
    feat = jnp.concatenate([conv_out, spec], axis=1)
    return (jnp.einsum('oc,bchw->bohw', w1, feat, precision=hp)
            + b1[None, :, None, None])


if __name__ == "__main__":
    B, C_in, C_out, H, W, K = 2, 4, 8, 16, 16, 3

    key = jax.random.PRNGKey(0)
    kx, k1, k2, k3, k4 = jax.random.split(key, 5)
    x = jax.random.normal(kx, (B, C_in, H, W), dtype=jnp.float32)

    fan_conv = C_in * K * K
    wconv = jax.random.uniform(k1, (C_out, C_in, K, K), jnp.float32,
                               -1.0, 1.0) / math.sqrt(float(fan_conv))
    bconv = jax.random.uniform(k2, (C_out,), jnp.float32,
                               -1.0, 1.0) / math.sqrt(float(fan_conv))
    fan_1 = C_out + 2 * C_in
    w1 = jax.random.uniform(k3, (C_out, fan_1), jnp.float32,
                            -1.0, 1.0) / math.sqrt(float(fan_1))
    b1 = jax.random.uniform(k4, (C_out,), jnp.float32,
                            -1.0, 1.0) / math.sqrt(float(fan_1))

    block = make_discrete_fourier_2d_conv_block_hybrid(
        wconv, bconv, w1, b1, height=H, width=W, kernel_size=K, padding=1)
    out = jax.block_until_ready(block(x))

    ref = _reference(x, wconv, bconv, w1, b1, padding=1)
    assert out.shape == ref.shape == (B, C_out, H, W)
    scale = max(1.0, float(jnp.max(jnp.abs(ref))))
    rel_err = float(jnp.max(jnp.abs(out - ref))) / scale
    assert rel_err < 2e-2, f"relative error too large: {rel_err}"
    print("KERNEL_OK")
</pallas_src>

<mosaic_0001>
module attributes {stable_mosaic.version = 11 : i64} {
  func.func @_hybrid_kernel(%arg0: i32, %arg1: memref<1x4x512xbf16, #tpu.memory_space<vmem>>, %arg2: memref<1x128x16xbf16, #tpu.memory_space<vmem>>, %arg3: memref<9x512xf32, #tpu.memory_space<vmem>>, %arg4: memref<8x36xbf16, #tpu.memory_space<vmem>>, %arg5: memref<8x1xf32, #tpu.memory_space<vmem>>, %arg6: memref<16x32xbf16, #tpu.memory_space<vmem>>, %arg7: memref<128x128xbf16, #tpu.memory_space<vmem>>, %arg8: memref<1x2x8x256xf32, #tpu.memory_space<vmem>>) attributes {dimension_semantics = [#tpu.dimension_semantics<parallel>], iteration_bounds = array<i64: 1>, scalar_prefetch = 0 : i64, scratch_operands = 0 : i64, tpu.core_type = #tpu.core_type<tc>, window_params = [{transform_indices = @transform_0, window_bounds = array<i64: 1, 4, 512>}, {transform_indices = @transform_1, window_bounds = array<i64: 1, 128, 16>}, {pipeline_mode = #tpu.pipeline_mode<synchronous>, transform_indices = @transform_2, window_bounds = array<i64: 9, 512>}, {pipeline_mode = #tpu.pipeline_mode<synchronous>, transform_indices = @transform_3, window_bounds = array<i64: 8, 36>}, {pipeline_mode = #tpu.pipeline_mode<synchronous>, transform_indices = @transform_4, window_bounds = array<i64: 8, 1>}, {pipeline_mode = #tpu.pipeline_mode<synchronous>, transform_indices = @transform_5, window_bounds = array<i64: 16, 32>}, {pipeline_mode = #tpu.pipeline_mode<synchronous>, transform_indices = @transform_6, window_bounds = array<i64: 128, 128>}, {transform_indices = @transform_7, window_bounds = array<i64: 1, 2, 8, 256>}]} {
    %c0 = arith.constant 0 : index
    %c0_0 = arith.constant 0 : index
    %c0_1 = arith.constant 0 : index
    %0 = vector.load %arg1[%c0, %c0_0, %c0_1] : memref<1x4x512xbf16, #tpu.memory_space<vmem>>, vector<1x4x512xbf16>
    %1 = vector.shape_cast %0 : vector<1x4x512xbf16> to vector<4x512xbf16>
    %2 = arith.extf %1 : vector<4x512xbf16> to vector<4x512xf32>
    %c0_2 = arith.constant 0 : index
    %c0_3 = arith.constant 0 : index
    %3 = vector.load %arg3[%c0_2, %c0_3] : memref<9x512xf32, #tpu.memory_space<vmem>>, vector<9x512xf32>
    %4 = vector.extract_strided_slice %2 {offsets = [0, 495], sizes = [4, 17], strides = [1, 1]} : vector<4x512xf32> to vector<4x17xf32>
    %5 = vector.extract_strided_slice %2 {offsets = [0, 0], sizes = [4, 495], strides = [1, 1]} : vector<4x512xf32> to vector<4x495xf32>
    %6 = tpu.concatenate %4, %5 in 1 : vector<4x17xf32>, vector<4x495xf32> -> vector<4x512xf32>
    %7 = vector.extract_strided_slice %3 {offsets = [0, 0], sizes = [1, 512], strides = [1, 1]} : vector<9x512xf32> to vector<1x512xf32>
    %8 = vector.broadcast %7 : vector<1x512xf32> to vector<4x512xf32>
    %9 = arith.mulf %6, %8 : vector<4x512xf32>
    %10 = vector.extract_strided_slice %2 {offsets = [0, 496], sizes = [4, 16], strides = [1, 1]} : vector<4x512xf32> to vector<4x16xf32>
    %11 = vector.extract_strided_slice %2 {offsets = [0, 0], sizes = [4, 496], strides = [1, 1]} : vector<4x512xf32> to vector<4x496xf32>
    %12 = tpu.concatenate %10, %11 in 1 : vector<4x16xf32>, vector<4x496xf32> -> vector<4x512xf32>
    %13 = vector.extract_strided_slice %3 {offsets = [1, 0], sizes = [1, 512], strides = [1, 1]} : vector<9x512xf32> to vector<1x512xf32>
    %14 = vector.broadcast %13 : vector<1x512xf32> to vector<4x512xf32>
    %15 = arith.mulf %12, %14 : vector<4x512xf32>
    %16 = vector.extract_strided_slice %2 {offsets = [0, 497], sizes = [4, 15], strides = [1, 1]} : vector<4x512xf32> to vector<4x15xf32>
    %17 = vector.extract_strided_slice %2 {offsets = [0, 0], sizes = [4, 497], strides = [1, 1]} : vector<4x512xf32> to vector<4x497xf32>
    %18 = tpu.concatenate %16, %17 in 1 : vector<4x15xf32>, vector<4x497xf32> -> vector<4x512xf32>
    %19 = vector.extract_strided_slice %3 {offsets = [2, 0], sizes = [1, 512], strides = [1, 1]} : vector<9x512xf32> to vector<1x512xf32>
    %20 = vector.broadcast %19 : vector<1x512xf32> to vector<4x512xf32>
    %21 = arith.mulf %18, %20 : vector<4x512xf32>
    %22 = vector.extract_strided_slice %2 {offsets = [0, 511], sizes = [4, 1], strides = [1, 1]} : vector<4x512xf32> to vector<4x1xf32>
    %23 = vector.extract_strided_slice %2 {offsets = [0, 0], sizes = [4, 511], strides = [1, 1]} : vector<4x512xf32> to vector<4x511xf32>
    %24 = tpu.concatenate %22, %23 in 1 : vector<4x1xf32>, vector<4x511xf32> -> vector<4x512xf32>
    %25 = vector.extract_strided_slice %3 {offsets = [3, 0], sizes = [1, 512], strides = [1, 1]} : vector<9x512xf32> to vector<1x512xf32>
    %26 = vector.broadcast %25 : vector<1x512xf32> to vector<4x512xf32>
    %27 = arith.mulf %24, %26 : vector<4x512xf32>
    %28 = vector.extract_strided_slice %3 {offsets = [4, 0], sizes = [1, 512], strides = [1, 1]} : vector<9x512xf32> to vector<1x512xf32>
    %29 = vector.broadcast %28 : vector<1x512xf32> to vector<4x512xf32>
    %30 = arith.mulf %2, %29 : vector<4x512xf32>
    %31 = vector.extract_strided_slice %2 {offsets = [0, 1], sizes = [4, 511], strides = [1, 1]} : vector<4x512xf32> to vector<4x511xf32>
    %32 = vector.extract_strided_slice %2 {offsets = [0, 0], sizes = [4, 1], strides = [1, 1]} : vector<4x512xf32> to vector<4x1xf32>
    %33 = tpu.concatenate %31, %32 in 1 : vector<4x511xf32>, vector<4x1xf32> -> vector<4x512xf32>
    %34 = vector.extract_strided_slice %3 {offsets = [5, 0], sizes = [1, 512], strides = [1, 1]} : vector<9x512xf32> to vector<1x512xf32>
    %35 = vector.broadcast %34 : vector<1x512xf32> to vector<4x512xf32>
    %36 = arith.mulf %33, %35 : vector<4x512xf32>
    %37 = vector.extract_strided_slice %2 {offsets = [0, 15], sizes = [4, 497], strides = [1, 1]} : vector<4x512xf32> to vector<4x497xf32>
    %38 = vector.extract_strided_slice %2 {offsets = [0, 0], sizes = [4, 15], strides = [1, 1]} : vector<4x512xf32> to vector<4x15xf32>
    %39 = tpu.concatenate %37, %38 in 1 : vector<4x497xf32>, vector<4x15xf32> -> vector<4x512xf32>
    %40 = vector.extract_strided_slice %3 {offsets = [6, 0], sizes = [1, 512], strides = [1, 1]} : vector<9x512xf32> to vector<1x512xf32>
    %41 = vector.broadcast %40 : vector<1x512xf32> to vector<4x512xf32>
    %42 = arith.mulf %39, %41 : vector<4x512xf32>
    %43 = vector.extract_strided_slice %2 {offsets = [0, 16], sizes = [4, 496], strides = [1, 1]} : vector<4x512xf32> to vector<4x496xf32>
    %44 = vector.extract_strided_slice %2 {offsets = [0, 0], sizes = [4, 16], strides = [1, 1]} : vector<4x512xf32> to vector<4x16xf32>
    %45 = tpu.concatenate %43, %44 in 1 : vector<4x496xf32>, vector<4x16xf32> -> vector<4x512xf32>
    %46 = vector.extract_strided_slice %3 {offsets = [7, 0], sizes = [1, 512], strides = [1, 1]} : vector<9x512xf32> to vector<1x512xf32>
    %47 = vector.broadcast %46 : vector<1x512xf32> to vector<4x512xf32>
    %48 = arith.mulf %45, %47 : vector<4x512xf32>
    %49 = vector.extract_strided_slice %2 {offsets = [0, 17], sizes = [4, 495], strides = [1, 1]} : vector<4x512xf32> to vector<4x495xf32>
    %50 = vector.extract_strided_slice %2 {offsets = [0, 0], sizes = [4, 17], strides = [1, 1]} : vector<4x512xf32> to vector<4x17xf32>
    %51 = tpu.concatenate %49, %50 in 1 : vector<4x495xf32>, vector<4x17xf32> -> vector<4x512xf32>
    %52 = vector.extract_strided_slice %3 {offsets = [8, 0], sizes = [1, 512], strides = [1, 1]} : vector<9x512xf32> to vector<1x512xf32>
    %53 = vector.broadcast %52 : vector<1x512xf32> to vector<4x512xf32>
    %54 = arith.mulf %51, %53 : vector<4x512xf32>
    %55 = tpu.concatenate %9, %15, %21, %27, %30, %36, %42, %48, %54 in 0 : vector<4x512xf32>, vector<4x512xf32>, vector<4x512xf32>, vector<4x512xf32>, vector<4x512xf32>, vector<4x512xf32>, vector<4x512xf32>, vector<4x512xf32>, vector<4x512xf32> -> vector<36x512xf32>
    %56 = arith.truncf %55 : vector<36x512xf32> to vector<36x512xbf16>
    %c0_4 = arith.constant 0 : index
    %c0_5 = arith.constant 0 : index
    %57 = vector.load %arg4[%c0_4, %c0_5] : memref<8x36xbf16, #tpu.memory_space<vmem>>, vector<8x36xbf16>
    %cst = arith.constant dense<0.000000e+00> : vector<8x512xf32>
    %58 = tpu.matmul %57, %56, %cst {dimension_numbers = #tpu.dot_dimension_numbers<[1], [0], [0], [1], [0, 0, 1, 1], [], []>} : vector<8x36xbf16>, vector<36x512xbf16>, vector<8x512xf32> -> vector<8x512xf32>
    %c0_6 = arith.constant 0 : index
    %c0_7 = arith.constant 0 : index
    %59 = vector.load %arg5[%c0_6, %c0_7] : memref<8x1xf32, #tpu.memory_space<vmem>>, vector<8x1xf32>
    %60 = vector.broadcast %59 : vector<8x1xf32> to vector<8x512xf32>
    %61 = arith.addf %58, %60 : vector<8x512xf32>
    %c0_8 = arith.constant 0 : index
    %c0_9 = arith.constant 0 : index
    %c0_10 = arith.constant 0 : index
    %62 = vector.load %arg2[%c0_8, %c0_9, %c0_10] : memref<1x128x16xbf16, #tpu.memory_space<vmem>>, vector<1x128x16xbf16>
    %63 = vector.shape_cast %62 : vector<1x128x16xbf16> to vector<128x16xbf16>
    %c0_11 = arith.constant 0 : index
    %c0_12 = arith.constant 0 : index
    %64 = vector.load %arg6[%c0_11, %c0_12] : memref<16x32xbf16, #tpu.memory_space<vmem>>, vector<16x32xbf16>
    %cst_13 = arith.constant dense<0.000000e+00> : vector<128x32xf32>
    %65 = tpu.matmul %63, %64, %cst_13 {dimension_numbers = #tpu.dot_dimension_numbers<[1], [0], [0], [1], [0, 0, 1, 1], [], []>} : vector<128x16xbf16>, vector<16x32xbf16>, vector<128x32xf32> -> vector<128x32xf32>
    %66 = vector.extract_strided_slice %65 {offsets = [0, 0], sizes = [64, 32], strides = [1, 1]} : vector<128x32xf32> to vector<64x32xf32>
    %67 = vector.extract_strided_slice %66 {offsets = [0, 0], sizes = [64, 16], strides = [1, 1]} : vector<64x32xf32> to vector<64x16xf32>
    %68 = vector.extract_strided_slice %66 {offsets = [0, 16], sizes = [64, 16], strides = [1, 1]} : vector<64x32xf32> to vector<64x16xf32>
    %69 = tpu.concatenate %67, %68 in 0 : vector<64x16xf32>, vector<64x16xf32> -> vector<128x16xf32>
    %70 = vector.extract_strided_slice %65 {offsets = [64, 0], sizes = [64, 32], strides = [1, 1]} : vector<128x32xf32> to vector<64x32xf32>
    %71 = vector.extract_strided_slice %70 {offsets = [0, 0], sizes = [64, 16], strides = [1, 1]} : vector<64x32xf32> to vector<64x16xf32>
    %72 = vector.extract_strided_slice %70 {offsets = [0, 16], sizes = [64, 16], strides = [1, 1]} : vector<64x32xf32> to vector<64x16xf32>
    %73 = tpu.concatenate %71, %72 in 0 : vector<64x16xf32>, vector<64x16xf32> -> vector<128x16xf32>
    %74 = tpu.concatenate %69, %73 in 1 : vector<128x16xf32>, vector<128x16xf32> -> vector<128x32xf32>
    %75 = arith.truncf %74 : vector<128x32xf32> to vector<128x32xbf16>
    %c0_14 = arith.constant 0 : index
    %c0_15 = arith.constant 0 : index
    %76 = vector.load %arg7[%c0_14, %c0_15] : memref<128x128xbf16, #tpu.memory_space<vmem>>, vector<128x128xbf16>
    %cst_16 = arith.constant dense<0.000000e+00> : vector<128x32xf32>
    %77 = tpu.matmul %76, %75, %cst_16 {dimension_numbers = #tpu.dot_dimension_numbers<[1], [0], [0], [1], [0, 0, 1, 1], [], []>} : vector<128x128xbf16>, vector<128x32xbf16>, vector<128x32xf32> -> vector<128x32xf32>
    %78 = vector.extract_strided_slice %61 {offsets = [0, 0], sizes = [8, 256], strides = [1, 1]} : vector<8x512xf32> to vector<8x256xf32>
    %79 = vector.extract_strided_slice %77 {offsets = [0, 0], sizes = [8, 16], strides = [1, 1]} : vector<128x32xf32> to vector<8x16xf32>
    %80 = vector.extract_strided_slice %77 {offsets = [8, 0], sizes = [8, 16], strides = [1, 1]} : vector<128x32xf32> to vector<8x16xf32>
    %81 = vector.extract_strided_slice %77 {offsets = [16, 0], sizes = [8, 16], strides = [1, 1]} : vector<128x32xf32> to vector<8x16xf32>
    %82 = vector.extract_strided_slice %77 {offsets = [24, 0], sizes = [8, 16], strides = [1, 1]} : vector<128x32xf32> to vector<8x16xf32>
    %83 = vector.extract_strided_slice %77 {offsets = [32, 0], sizes = [8, 16], strides = [1, 1]} : vector<128x32xf32> to vector<8x16xf32>
    %84 = vector.extract_strided_slice %77 {offsets = [40, 0], sizes = [8, 16], strides = [1, 1]} : vector<128x32xf32> to vector<8x16xf32>
    %85 = vector.extract_strided_slice %77 {offsets = [48, 0], sizes = [8, 16], strides = [1, 1]} : vector<128x32xf32> to vector<8x16xf32>
    %86 = vector.extract_strided_slice %77 {offsets = [56, 0], sizes = [8, 16], strides = [1, 1]} : vector<128x32xf32> to vector<8x16xf32>
    %87 = vector.extract_strided_slice %77 {offsets = [64, 0], sizes = [8, 16], strides = [1, 1]} : vector<128x32xf32> to vector<8x16xf32>
    %88 = vector.extract_strided_slice %77 {offsets = [72, 0], sizes = [8, 16], strides = [1, 1]} : vector<128x32xf32> to vector<8x16xf32>
    %89 = vector.extract_strided_slice %77 {offsets = [80, 0], sizes = [8, 16], strides = [1, 1]} : vector<128x32xf32> to vector<8x16xf32>
    %90 = vector.extract_strided_slice %77 {offsets = [88, 0], sizes = [8, 16], strides = [1, 1]} : vector<128x32xf32> to vector<8x16xf32>
    %91 = vector.extract_strided_slice %77 {offsets = [96, 0], sizes = [8, 16], strides = [1, 1]} : vector<128x32xf32> to vector<8x16xf32>
    %92 = vector.extract_strided_slice %77 {offsets = [104, 0], sizes = [8, 16], strides = [1, 1]} : vector<128x32xf32> to vector<8x16xf32>
    %93 = vector.extract_strided_slice %77 {offsets = [112, 0], sizes = [8, 16], strides = [1, 1]} : vector<128x32xf32> to vector<8x16xf32>
    %94 = vector.extract_strided_slice %77 {offsets = [120, 0], sizes = [8, 16], strides = [1, 1]} : vector<128x32xf32> to vector<8x16xf32>
    %95 = tpu.concatenate %79, %80, %81, %82, %83, %84, %85, %86, %87, %88, %89, %90, %91, %92, %93, %94 in 1 : vector<8x16xf32>, vector<8x16xf32>, vector<8x16xf32>, vector<8x16xf32>, vector<8x16xf32>, vector<8x16xf32>, vector<8x16xf32>, vector<8x16xf32>, vector<8x16xf32>, vector<8x16xf32>, vector<8x16xf32>, vector<8x16xf32>, vector<8x16xf32>, vector<8x16xf32>, vector<8x16xf32>, vector<8x16xf32> -> vector<8x256xf32>
    %96 = arith.addf %78, %95 : vector<8x256xf32>
    %c0_17 = arith.constant 0 : index
    %c0_18 = arith.constant 0 : index
    %c0_19 = arith.constant 0 : index
    %c0_20 = arith.constant 0 : index
    %97 = vector.load %arg8[%c0_17, %c0_18, %c0_19, %c0_20] : memref<1x2x8x256xf32, #tpu.memory_space<vmem>>, vector<1x1x8x256xf32>
    %98 = vector.shape_cast %97 : vector<1x1x8x256xf32> to vector<8x256xf32>
    %99 = vector.shape_cast %96 : vector<8x256xf32> to vector<1x1x8x256xf32>
    tpu.vector_store %arg8[%c0_17, %c0_18, %c0_19, %c0_20], %99 {strides = array<i32>} : memref<1x2x8x256xf32, #tpu.memory_space<vmem>>, vector<1x1x8x256xf32>,
    %100 = vector.extract_strided_slice %61 {offsets = [0, 256], sizes = [8, 256], strides = [1, 1]} : vector<8x512xf32> to vector<8x256xf32>
    %101 = vector.extract_strided_slice %77 {offsets = [0, 16], sizes = [8, 16], strides = [1, 1]} : vector<128x32xf32> to vector<8x16xf32>
    %102 = vector.extract_strided_slice %77 {offsets = [8, 16], sizes = [8, 16], strides = [1, 1]} : vector<128x32xf32> to vector<8x16xf32>
    %103 = vector.extract_strided_slice %77 {offsets = [16, 16], sizes = [8, 16], strides = [1, 1]} : vector<128x32xf32> to vector<8x16xf32>
    %104 = vector.extract_strided_slice %77 {offsets = [24, 16], sizes = [8, 16], strides = [1, 1]} : vector<128x32xf32> to vector<8x16xf32>
    %105 = vector.extract_strided_slice %77 {offsets = [32, 16], sizes = [8, 16], strides = [1, 1]} : vector<128x32xf32> to vector<8x16xf32>
    %106 = vector.extract_strided_slice %77 {offsets = [40, 16], sizes = [8, 16], strides = [1, 1]} : vector<128x32xf32> to vector<8x16xf32>
    %107 = vector.extract_strided_slice %77 {offsets = [48, 16], sizes = [8, 16], strides = [1, 1]} : vector<128x32xf32> to vector<8x16xf32>
    %108 = vector.extract_strided_slice %77 {offsets = [56, 16], sizes = [8, 16], strides = [1, 1]} : vector<128x32xf32> to vector<8x16xf32>
    %109 = vector.extract_strided_slice %77 {offsets = [64, 16], sizes = [8, 16], strides = [1, 1]} : vector<128x32xf32> to vector<8x16xf32>
    %110 = vector.extract_strided_slice %77 {offsets = [72, 16], sizes = [8, 16], strides = [1, 1]} : vector<128x32xf32> to vector<8x16xf32>
    %111 = vector.extract_strided_slice %77 {offsets = [80, 16], sizes = [8, 16], strides = [1, 1]} : vector<128x32xf32> to vector<8x16xf32>
    %112 = vector.extract_strided_slice %77 {offsets = [88, 16], sizes = [8, 16], strides = [1, 1]} : vector<128x32xf32> to vector<8x16xf32>
    %113 = vector.extract_strided_slice %77 {offsets = [96, 16], sizes = [8, 16], strides = [1, 1]} : vector<128x32xf32> to vector<8x16xf32>
    %114 = vector.extract_strided_slice %77 {offsets = [104, 16], sizes = [8, 16], strides = [1, 1]} : vector<128x32xf32> to vector<8x16xf32>
    %115 = vector.extract_strided_slice %77 {offsets = [112, 16], sizes = [8, 16], strides = [1, 1]} : vector<128x32xf32> to vector<8x16xf32>
    %116 = vector.extract_strided_slice %77 {offsets = [120, 16], sizes = [8, 16], strides = [1, 1]} : vector<128x32xf32> to vector<8x16xf32>
    %117 = tpu.concatenate %101, %102, %103, %104, %105, %106, %107, %108, %109, %110, %111, %112, %113, %114, %115, %116 in 1 : vector<8x16xf32>, vector<8x16xf32>, vector<8x16xf32>, vector<8x16xf32>, vector<8x16xf32>, vector<8x16xf32>, vector<8x16xf32>, vector<8x16xf32>, vector<8x16xf32>, vector<8x16xf32>, vector<8x16xf32>, vector<8x16xf32>, vector<8x16xf32>, vector<8x16xf32>, vector<8x16xf32>, vector<8x16xf32> -> vector<8x256xf32>
    %118 = arith.addf %100, %117 : vector<8x256xf32>
    %c0_21 = arith.constant 0 : index
    %c1 = arith.constant 1 : index
    %c0_22 = arith.constant 0 : index
    %c0_23 = arith.constant 0 : index
    %119 = vector.load %arg8[%c0_21, %c1, %c0_22, %c0_23] : memref<1x2x8x256xf32, #tpu.memory_space<vmem>>, vector<1x1x8x256xf32>
    %120 = vector.shape_cast %119 : vector<1x1x8x256xf32> to vector<8x256xf32>
    %121 = vector.shape_cast %118 : vector<8x256xf32> to vector<1x1x8x256xf32>
    tpu.vector_store %arg8[%c0_21, %c1, %c0_22, %c0_23], %121 {strides = array<i32>} : memref<1x2x8x256xf32, #tpu.memory_space<vmem>>, vector<1x1x8x256xf32>,
    return
  }
  func.func @transform_0(%arg0: i32) -> (i32, i32, i32) {
    %c0_i32 = arith.constant 0 : i32
    %c0_i32_0 = arith.constant 0 : i32
    %c0_i32_1 = arith.constant 0 : i32
    return %arg0, %c0_i32, %c0_i32_0 : i32, i32, i32
  }
  func.func @transform_1(%arg0: i32) -> (i32, i32, i32) {
    %c0_i32 = arith.constant 0 : i32
    %c0_i32_0 = arith.constant 0 : i32
    %c0_i32_1 = arith.constant 0 : i32
    return %arg0, %c0_i32, %c0_i32_0 : i32, i32, i32
  }
  func.func @transform_2(%arg0: i32) -> (i32, i32) {
    %c0_i32 = arith.constant 0 : i32
    %c0_i32_0 = arith.constant 0 : i32
    %c0_i32_1 = arith.constant 0 : i32
    return %c0_i32, %c0_i32_0 : i32, i32
  }
  func.func @transform_3(%arg0: i32) -> (i32, i32) {
    %c0_i32 = arith.constant 0 : i32
    %c0_i32_0 = arith.constant 0 : i32
    %c0_i32_1 = arith.constant 0 : i32
    return %c0_i32, %c0_i32_0 : i32, i32
  }
  func.func @transform_4(%arg0: i32) -> (i32, i32) {
    %c0_i32 = arith.constant 0 : i32
    %c0_i32_0 = arith.constant 0 : i32
    %c0_i32_1 = arith.constant 0 : i32
    return %c0_i32, %c0_i32_0 : i32, i32
  }
  func.func @transform_5(%arg0: i32) -> (i32, i32) {
    %c0_i32 = arith.constant 0 : i32
    %c0_i32_0 = arith.constant 0 : i32
    %c0_i32_1 = arith.constant 0 : i32
    return %c0_i32, %c0_i32_0 : i32, i32
  }
  func.func @transform_6(%arg0: i32) -> (i32, i32) {
    %c0_i32 = arith.constant 0 : i32
    %c0_i32_0 = arith.constant 0 : i32
    %c0_i32_1 = arith.constant 0 : i32
    return %c0_i32, %c0_i32_0 : i32, i32
  }
  func.func @transform_7(%arg0: i32) -> (i32, i32, i32, i32) {
    %c0_i32 = arith.constant 0 : i32
    %c0_i32_0 = arith.constant 0 : i32
    %c0_i32_1 = arith.constant 0 : i32
    %c0_i32_2 = arith.constant 0 : i32
    return %arg0, %c0_i32, %c0_i32_0, %c0_i32_1 : i32, i32, i32, i32
  }
}

</mosaic_0001>

<bundles_post_ra>
// kernel: forward.1
= control target key start
LH: loop header
LB: loop body
LE: loop exit
PB: predicated region body
PF: predicated region fallthrough
CT: control target
= control target key end

     0   :  { %s1443_s26 = smov 16   ;;  %s1444_s27 = smov 1   ;;  %v1451_v7 = vmov 0   ;;  %v60_v8 = vlaneseq  ;;  %vm89_vm0 = vcmask 130048   ;;  %vm165_vm1 = vcmask 7168   ;;  %s2010_s0 = inlined_call_operand.vmem [shape: bf16[1,4,512], index: 0, kind: input, shape index: {}]   ;;  %s2011_s5 = inlined_call_operand.vmem [shape: bf16[16,32], index: 5, kind: input, shape index: {}]   ;;  %s2012_s1 = inlined_call_operand.vmem [shape: bf16[1,128,16], index: 1, kind: input, shape index: {}]   ;;  %s2013_s2 = inlined_call_operand.vmem [shape: f32[9,512], index: 2, kind: input, shape index: {}]   ;;  %s2014_s3 = inlined_call_operand.vmem [shape: bf16[8,36], index: 3, kind: input, shape index: {}]   ;;  %s2015_s4 = inlined_call_operand.vmem [shape: f32[8,1], index: 4, kind: input, shape index: {}]   ;;  %s2016_s6 = inlined_call_operand.vmem [shape: bf16[128,128], index: 6, kind: input, shape index: {}]   ;;  %s2017_s7 = inlined_call_operand.vmem [shape: f32[1,2,8,256], index: 7, kind: output, shape index: {}]  }
   0x1   :  { %v27_v0 = vld [vmem:[%s2010_s0] sm:$0xff]  ;;  %s1445_s0 = smov 15   ;;  %s1446_s28 = smov 17   ;;  %511 = vmatprep.mubr.bf16.mxu0 %v1451_v7  ;;  %1425 = vset.pattern.permute.xlu0 %v1451_v7  ;;  %v1548_v17 = vld [vmem:[%s2013_s2 + $0x8] sm:$0xff]  ;;  %vm127_vm2 = vcmask 121856   ;;  %vm51_vm3 = vcmask 138240  }
   0x2   :  { %v1500_v1 = vunpack.c.h.bf16 %v27_v0  ;;  %v1502_v2 = vunpack.c.l.bf16 %v27_v0  ;;  %s1447_s29 = smov 112   ;;  %s1448_s30 = smov 127   ;;  %v1526_v9 = vshrl.u32 %v60_v8, 7  ;;  %v1541_v14 = vld [vmem:[%s2013_s2] sm:$0xff]  ;;  %vm426_vm4 = vcmask 1043456  }
   0x3   :  { %s1449_s8 = smov 113   ;;  %s1450_s9 = smov 111   ;;  %vm304_vm5 = vcmask 916480   ;;  %vm228_vm6 = vcmask 1039360   ;;  %vm266_vm7 = vcmask 924672   ;;  %vm342_vm8 = vcmask 908288  }
   0x4   :  { %v39_v3 = vcombine.high %v1500_v1, %v1500_v1  ;;  %v44_v4 = vcombine.high %v1502_v2, %v1502_v2  ;;  %v1531_v11 = vsub.s32 1, %v1526_v9  ;;  %v1536_v13 = vsub.s32 3, %v1526_v9  ;;  %s1452_s12 = smov 32   ;;  %s1454_s13 = smov 96  }
   0x5   :  { %v1553_v19 = vsub.s32 2, %v1526_v9  ;;  %v1556_v20 = vsub.s32 0, %v1526_v9  ;;  %v1567_v25 = vsub.s32 4, %v1526_v9  ;;  %v1618_v61 = vsub.s32 5, %v1526_v9  ;;  %s1455_s14 = smov 80   ;;  %s1456_s15 = smov 64  }
   0x6   :  { %80 = vrot.lane.b32.xlu1 %v39_v3, %s1443_s26  ;;  %v1305_v5 = vpack.i.bf16 %v44_v4, %v1502_v2  ;;  %v1330_v6 = vpack.i.bf16 %v1500_v1, %v44_v4  ;;  %v101_v21 = vrot.slane %v1541_v14, %v1531_v11  ;;  %v105_v23 = vrot.slane %v1548_v17, %v1531_v11 }
   0x7   :  { %v181_v24 = vrot.slane %v1548_v17, %v1536_v13  ;;  %v177_v27 = vrot.slane %v1541_v14, %v1536_v13  ;;  %v139_v32 = vrot.slane %v1541_v14, %v1553_v19  ;;  %v67_v33 = vrot.slane %v1548_v17, %v1556_v20 }
   0x8   :  { %1306 = vrot.lane.b32.xlu0 %v1305_v5, %s1443_s26  ;;  %v143_v34 = vrot.slane %v1548_v17, %v1553_v19  ;;  %v197_v42 = vrot.slane %v1541_v14, %v1567_v25  ;;  %v201_v43 = vrot.slane %v1548_v17, %v1567_v25  ;;  %v63_v50 = vrot.slane %v1541_v14, %v1556_v20 }
   0x9   :  { %vm466_vm9 = vcmask 1041408   ;;  %vm462_vm10 = vcmask 293888   ;;  %vm1092_vm11 = vcmask 261120   ;;  %vm1094_vm12 = vcmask 392192  }
   0xa   :  { %156 = vrot.lane.b32.xlu1 %v39_v3, %s1444_s27  ;;  %v214_v62 = vcombine.low %v197_v42, %v201_v43  ;;  %vm1096_vm13 = vcmask 523264   ;;  %vm1098_vm14 = vcmask 654336   ;;  %vm1100_vm15 = vcmask 785408  }
   0xc   :  { %1311 = vrot.lane.b32.xlu0 %v1305_v5, %s1444_s27 }
   0xe   :  { %1321 = vrot.lane.b32.xlu1 %v1305_v5, %s1445_s0 }
  0x10   :  { %1316 = vrot.lane.b32.xlu0 %v1305_v5, %s1446_s28 }
  0x12   :  { %118 = vrot.lane.b32.xlu1 %v39_v3, %s1445_s0 }
  0x14   :  { %40 = vrot.lane.b32.xlu0 %v39_v3, %s1446_s28 }
  0x16   :  { %1331 = vrot.lane.b32.xlu1 %v1330_v6, %s1447_s29 }
  0x18   :  { %1326 = vrot.lane.b32.xlu0 %v1330_v6, %s1448_s30 }
  0x1a   :  { %296 = vrot.lane.b32.xlu1 %v1502_v2, %s1447_s29 }
  0x1c   :  { %220 = vrot.lane.b32.xlu0 %v1502_v2, %s1448_s30 }
  0x1e   :  { %258 = vrot.lane.b32.xlu1 %v1502_v2, %s1449_s8 }
  0x20   :  { %1336 = vrot.lane.b32.xlu0 %v1330_v6, %s1449_s8  ;;  %v1625_v6 = vsub.s32 7, %v1526_v9 }
  0x22   :  { %338 = vrot.lane.b32.xlu1 %v1500_v1, %s1450_s9 }
  0x24   :  { %1341 = vrot.lane.b32.xlu0 %v1305_v5, %s1450_s9 }
  0x26   :  { %163 = vrot.lane.b32.xlu1 %v1500_v1, %s1444_s27 }
  0x28   :  { %87 = vrot.lane.b32.xlu0 %v1500_v1, %s1443_s26 }
  0x2a   :  { %125 = vrot.lane.b32.xlu1 %v1500_v1, %s1445_s0 }
  0x2c   :  { %49 = vrot.lane.b32.xlu0 %v1500_v1, %s1446_s28 }
  0x2e   :  { %302 = vrot.lane.b32.xlu1 %v39_v3, %s1447_s29 }
  0x30   :  { %226 = vrot.lane.b32.xlu0 %v39_v3, %s1448_s30 }
  0x32   :  { %340 = vrot.lane.b32.xlu1 %v39_v3, %s1450_s9 }
  0x34   :  { %264 = vrot.lane.b32.xlu0 %v39_v3, %s1449_s8 }
  0x78   :  { %v1528_v10 = vpop.permute.xlu1 %80 }
  0x7a   :  { %v1533_v12 = vpop.permute.xlu0 %1306 }
  0x7b   :  { %v1309_v15 = vunpack.i.h.bf16 %v1533_v12  ;;  %v1308_v16 = vunpack.i.l.bf16 %v1533_v12 }
  0x7c   :  { %v1550_v18 = vpop.permute.xlu1 %156 }
  0x7d   :  { %v90_v26 = vsel %vm89_vm0, %v1308_v16, %v1309_v15  ;;  %v97_v30 = vsel %vm89_vm0, %v1528_v10, %v1308_v16 }
  0x7e   :  { %v1560_v22 = vpop.permute.xlu0 %1311  ;;  %v115_v40 = vmul.f32 %v105_v23, %v90_v26  ;;  %v114_v44 = vmul.f32 %v101_v21, %v97_v30 }
  0x7f   :  { %v1314_v28 = vunpack.i.h.bf16 %v1560_v22  ;;  %v1313_v29 = vunpack.i.l.bf16 %v1560_v22 }
  0x80   :  { %v1578_v31 = vpop.permute.xlu1 %1321  ;;  %v377_v58 = vrot.slane %v115_v40, 4  ;;  %v376_v60 = vrot.slane %v114_v44, 4  ;;  %v321_v40 = vrot.slane %v1548_v17, %v1625_v6 }
  0x81   :  { %v166_v35 = vsel %vm165_vm1, %v1313_v29, %v1314_v28  ;;  %v173_v36 = vsel %vm165_vm1, %v1550_v18, %v1313_v29  ;;  %v1324_v37 = vunpack.i.h.bf16 %v1578_v31  ;;  %v1323_v38 = vunpack.i.l.bf16 %v1578_v31 }
  0x82   :  { %v1593_v39 = vpop.permute.xlu0 %1316  ;;  %v191_v41 = vmul.f32 %v181_v24, %v166_v35  ;;  %v190_v48 = vmul.f32 %v177_v27, %v173_v36  ;;  %v218_v35 = vmul.f32 %v214_v62, %v1502_v2  ;;  %v245_v36 = vrot.slane %v1548_v17, %v1618_v61  ;;  %v1657_v2 = vld [vmem:[%s2013_s2 + $0x10] sm:$0xff] }
  0x83   :  { %v1319_v45 = vunpack.i.h.bf16 %v1593_v39  ;;  %v1318_v46 = vunpack.i.l.bf16 %v1593_v39  ;;  %v128_v47 = vsel %vm127_vm2, %v1323_v38, %v1324_v37 }
  0x84   :  { %v1604_v49 = vpop.permute.xlu1 %118  ;;  %v153_v51 = vmul.f32 %v143_v34, %v128_v47  ;;  %v389_v52 = vrot.slane %v191_v41, 4  ;;  %v388_v5 = vrot.slane %v190_v48, 4  ;;  %v1640_v34 = vsub.s32 6, %v1526_v9  ;;  %v1662_v9 = vld [vmem:[%s2013_s2 + $0x18] sm:$0xff] }
  0x85   :  { %v135_v53 = vsel %vm127_vm2, %v1604_v49, %v1323_v38  ;;  %v52_v54 = vsel %vm51_vm3, %v1318_v46, %v1319_v45  ;;  %v317_v41 = vrot.slane %v1541_v14, %v1625_v6  ;;  %v253_v12 = vrot.slane %v1662_v9, %v1618_v61 }
  0x86   :  { %v152_v55 = vmul.f32 %v139_v32, %v135_v53  ;;  %v1613_v56 = vpop.permute.xlu0 %40  ;;  %v77_v57 = vmul.f32 %v67_v33, %v52_v54  ;;  %v432_v4 = vsel %vm426_vm4, %v153_v51, %v389_v52  ;;  %v241_v33 = vrot.slane %v1541_v14, %v1618_v61 }
  0x87   :  { %v59_v59 = vsel %vm51_vm3, %v1613_v56, %v1318_v46  ;;  %v398_v52 = vcombine.high %v218_v35, %v218_v35  ;;  %v283_v53 = vrot.slane %v1548_v17, %v1640_v34  ;;  %v185_v54 = vrot.slane %v1657_v2, %v1536_v13 }
  0x88   :  { %v76_v63 = vmul.f32 %v63_v50, %v59_v59  ;;  %v1620_v0 = vpop.permute.xlu1 %1331  ;;  %v428_v3 = vsel %vm426_vm4, %v77_v57, %v377_v58  ;;  %v431_v24 = vsel %vm426_vm4, %v152_v55, %v388_v5  ;;  %v279_v50 = vrot.slane %v1541_v14, %v1640_v34 }
  0x89   :  { %v444_v8 = vpack.c.bf16 %v432_v4, %v428_v3  ;;  %v1334_v16 = vunpack.i.h.bf16 %v1620_v0  ;;  %v1333_v26 = vunpack.i.l.bf16 %v1620_v0  ;;  %v189_v55 = vrot.slane %v1662_v9, %v1536_v13  ;;  %v455_v0 = vld [vmem:[%s2014_s3] sm:$0xf] }
  0x8a   :  { %v1628_v21 = vpop.permute.xlu0 %1326  ;;  %v427_v23 = vsel %vm426_vm4, %v76_v63, %v376_v60  ;;  %v109_v60 = vrot.slane %v1657_v2, %v1531_v11  ;;  %v113_v14 = vrot.slane %v1662_v9, %v1531_v11  ;;  %v147_v63 = vrot.slane %v1657_v2, %v1553_v19 }
  0x8b   :  { %v1329_v27 = vunpack.i.h.bf16 %v1628_v21  ;;  %v1328_v29 = vunpack.i.l.bf16 %v1628_v21  ;;  %479 = vmatprep.subr.bf16.mxu0 %v444_v8  ;;  %v443_v30 = vpack.c.bf16 %v431_v24, %v427_v23  ;;  %v306_v43 = vsel %vm304_vm5, %v1333_v26, %v1334_v16 }
  0x8c   :  { %v1635_v32 = vpop.permute.xlu1 %296  ;;  %v331_v57 = vmul.f32 %v321_v40, %v306_v43  ;;  %v151_v13 = vrot.slane %v1662_v9, %v1553_v19  ;;  %v71_v8 = vrot.slane %v1657_v2, %v1556_v20  ;;  %v75_v11 = vrot.slane %v1662_v9, %v1556_v20  ;;  %v1182_v20 = vld [vmem:[%s2013_s2 + $0x28] ss:$0 sm:$0xff] }
  0x8d   :  { %480 = vmatpush1.bf16.msra.mxu0 %v443_v30  ;;  %v230_v38 = vsel %vm228_vm6, %v1328_v29, %v1329_v27  ;;  %v305_v44 = vsel %vm304_vm5, %v1635_v32, %v1333_v26  ;;  %v205_v19 = vrot.slane %v1657_v2, %v1567_v25  ;;  %v209_v26 = vrot.slane %v1662_v9, %v1567_v25 }
  0x8e   :  { %v1652_v42 = vpop.permute.xlu0 %220  ;;  %v255_v51 = vmul.f32 %v245_v36, %v230_v38  ;;  %v330_v58 = vmul.f32 %v317_v41, %v305_v44  ;;  %v325_v43 = vrot.slane %v1657_v2, %v1625_v6  ;;  %v329_v25 = vrot.slane %v1662_v9, %v1625_v6  ;;  %v1183_v6 = vld [vmem:[%s2013_s2 + $0x30] ss:$0 sm:$0xff] }
  0x8f   :  { %v229_v46 = vsel %vm228_vm6, %v1652_v42, %v1328_v29  ;;  %v419_v29 = vrot.slane %v331_v57, 4 }
  0x90   :  { %v254_v47 = vmul.f32 %v241_v33, %v229_v46  ;;  %v1671_v48 = vpop.permute.xlu1 %258  ;;  %v407_v5 = vrot.slane %v255_v51, 4  ;;  %v418_v30 = vrot.slane %v330_v58, 4 }
  0x92   :  { %v1681_v59 = vpop.permute.xlu0 %1336  ;;  %v406_v3 = vrot.slane %v254_v47, 4  ;;  %v436_v46 = vsel %vm426_vm4, %v398_v52, %v407_v5 }
  0x93   :  { %v1339_v62 = vunpack.i.h.bf16 %v1681_v59  ;;  %v1338_v17 = vunpack.i.l.bf16 %v1681_v59 }
  0x94   :  { %v1693_v4 = vpop.permute.xlu1 %338 }
  0x95   :  { %v267_v23 = vsel %vm266_vm7, %v1671_v48, %v1338_v17  ;;  %v268_v24 = vsel %vm266_vm7, %v1338_v17, %v1339_v62 }
  0x96   :  { %v292_v33 = vmul.f32 %v279_v50, %v267_v23  ;;  %v293_v36 = vmul.f32 %v283_v53, %v268_v24  ;;  %v1708_v38 = vpop.permute.xlu0 %1341  ;;  %v435_v50 = vsel %vm426_vm4, %v218_v35, %v406_v3  ;;  %v1181_v35 = vld [vmem:[%s2013_s2 + $0x20] ss:$0 sm:$0xff]  ;;  %v215_v3 = vcombine.low %v205_v19, %v209_v26 }
  0x97   :  { %v1344_v40 = vunpack.i.h.bf16 %v1708_v38  ;;  %v1343_v41 = vunpack.i.l.bf16 %v1708_v38  ;;  %v249_v19 = vrot.slane %v1657_v2, %v1618_v61 }
  0x98   :  { %v164_v44 = vpop.permute.xlu1 %163  ;;  %v440_v47 = vsel %vm426_vm4, %v293_v36, %v419_v29  ;;  %v439_v51 = vsel %vm426_vm4, %v292_v33, %v418_v30 }
  0x99   :  { %v344_v53 = vsel %vm342_vm8, %v1344_v40, %v1693_v4  ;;  %v167_v57 = vsel %vm165_vm1, %v1314_v28, %v164_v44  ;;  %v168_v58 = vsel %vm165_vm1, %v164_v44, %v1550_v18  ;;  %v448_v17 = vpack.c.bf16 %v440_v47, %v436_v46 }
  0x9a   :  { %v369_v23 = vmul.f32 %v1182_v20, %v344_v53  ;;  %v192_v24 = vmul.f32 %v185_v54, %v167_v57  ;;  %v88_v52 = vpop.permute.xlu0 %87  ;;  %v447_v5 = vpack.c.bf16 %v439_v51, %v435_v50  ;;  %v193_v29 = vmul.f32 %v189_v55, %v168_v58 }
  0x9b   :  { %v91_v22 = vsel %vm89_vm0, %v1309_v15, %v88_v52  ;;  %v92_v28 = vsel %vm89_vm0, %v88_v52, %v1528_v10  ;;  %481 = vmatprep.subr.bf16.mxu0 %v448_v17  ;;  %v343_v18 = vsel %vm342_vm8, %v1343_v41, %v1344_v40  ;;  %v219_v40 = vmul.f32 %v215_v3, %v1500_v1 }
  0x9c   :  { %v116_v54 = vmul.f32 %v109_v60, %v91_v22  ;;  %v117_v30 = vmul.f32 %v113_v14, %v92_v28  ;;  %v126_v33 = vpop.permute.xlu1 %125  ;;  %482 = vmatpush1.bf16.msra.mxu0 %v447_v5  ;;  %v452_v55 = vpack.c.bf16 %v369_v23, %v369_v23  ;;  %v368_v26 = vmul.f32 %v1181_v35, %v343_v18 }
  0x9d   :  { %v129_v15 = vsel %vm127_vm2, %v1324_v37, %v126_v33  ;;  %v130_v10 = vsel %vm127_vm2, %v126_v33, %v1604_v49  ;;  %v390_v36 = vrot.slane %v192_v24, 4  ;;  %v391_v44 = vrot.slane %v193_v29, 4 }
  0x9e   :  { %v154_v60 = vmul.f32 %v147_v63, %v129_v15  ;;  %v155_v14 = vmul.f32 %v151_v13, %v130_v10  ;;  %v50_v20 = vpop.permute.xlu0 %49  ;;  %1185 = vmatprep.subr.msk.bf16.mxu0 %vm466_vm9, %v452_v55  ;;  %v451_v37 = vpack.c.bf16 %v368_v26, %v368_v26  ;;  %v378_v49 = vrot.slane %v116_v54, 4  ;;  %v1427_v15 = vld [vmem:[%s2012_s1] sm:$0xff]   ;;  %v1428_v10 = vld [vmem:[%s2012_s1 + $0x8] sm:$0xff]   ;;  %v1429_v55 = vld [vmem:[%s2012_s1 + $0x10] sm:$0xff]  }
  0x9f   :  { %v53_v61 = vsel %vm51_vm3, %v1319_v45, %v50_v20  ;;  %v54_v31 = vsel %vm51_vm3, %v50_v20, %v1613_v56  ;;  %v379_v46 = vrot.slane %v117_v30, 4  ;;  %v287_v52 = vrot.slane %v1657_v2, %v1640_v34  ;;  %v1430_v26 = vld [vmem:[%s2012_s1 + $0x18] sm:$0xff]  }
  0xa0   :  { %v78_v47 = vmul.f32 %v71_v8, %v53_v61  ;;  %v79_v50 = vmul.f32 %v75_v11, %v54_v31  ;;  %v303_v63 = vpop.permute.xlu1 %302  ;;  %v433_v13 = vsel %vm426_vm4, %v154_v60, %v390_v36  ;;  %v468_v39 = vsel %vm466_vm9, %v451_v37, 0  ;;  %v1431_v36 = vld [vmem:[%s2012_s1 + $0x20] sm:$0xff]   ;;  %v1432_v60 = vld [vmem:[%s2012_s1 + $0x28] sm:$0xff]   ;;  %v1434_v20 = vld [vmem:[%s2012_s1 + $0x38] sm:$0xff]  }
  0xa1   :  { %v307_v1 = vsel %vm304_vm5, %v1334_v16, %v303_v63  ;;  %v313_v56 = vsel %vm304_vm5, %v303_v63, %v1635_v32  ;;  %484 = vmatpush1.bf16.msra.mxu0 %v468_v39  ;;  %v434_v11 = vsel %vm426_vm4, %v155_v14, %v391_v44  ;;  %v399_v35 = vcombine.high %v219_v40, %v219_v40  ;;  %v1433_v14 = vld [vmem:[%s2012_s1 + $0x30] sm:$0xff]  }
  0xa2   :  { %v429_v45 = vsel %vm426_vm4, %v78_v47, %v378_v49  ;;  %v227_v51 = vpop.permute.xlu0 %226  ;;  %v430_v8 = vsel %vm426_vm4, %v79_v50, %v379_v46  ;;  %v332_v32 = vmul.f32 %v325_v43, %v307_v1  ;;  %v333_v21 = vmul.f32 %v329_v25, %v313_v56 }
  0xa3   :  { %v231_v16 = vsel %vm228_vm6, %v1329_v27, %v227_v51  ;;  %v237_v53 = vsel %vm228_vm6, %v227_v51, %v1652_v42  ;;  %v446_v57 = vpack.c.bf16 %v434_v11, %v430_v8  ;;  %v445_v58 = vpack.c.bf16 %v433_v13, %v429_v45 }
  0xa4   :  { %v256_v17 = vmul.f32 %v249_v19, %v231_v16  ;;  %v257_v23 = vmul.f32 %v253_v12, %v237_v53  ;;  %v341_v24 = vpop.permute.xlu1 %340  ;;  %v291_v27 = vrot.slane %v1662_v9, %v1640_v34  ;;  %1186 = vmatmul.mubr.msk.bf16.vlgmr.msra.gmra.mrb[0].mxu0 %vm462_vm10, %v455_v0  ;;  %v1184_v34 = vld [vmem:[%s2013_s2 + $0x38] ss:$0 sm:$0xff]  ;;  %v420_v25 = vrot.slane %v332_v32, 4 }
  0xa5   :  { %520 = vmatprep.subr.bf16.mxu0 %v446_v57  ;;  %v345_v43 = vsel %vm342_vm8, %v1693_v4, %v341_v24  ;;  %552 = vmatprep.mubr.bf16.mxu0 %v1451_v7  ;;  %v351_v9 = vsel %vm342_vm8, %v341_v24, %v1343_v41  ;;  %v421_v29 = vrot.slane %v333_v21, 4 }
  0xa6   :  { %v408_v42 = vrot.slane %v256_v17, 4  ;;  %v265_v5 = vpop.permute.xlu0 %264  ;;  %521 = vmatpush1.bf16.msra.mxu0 %v445_v58  ;;  %v409_v2 = vrot.slane %v257_v23, 4  ;;  %v370_v18 = vmul.f32 %v1183_v6, %v345_v43  ;;  %v371_v54 = vmul.f32 %v1184_v34, %v351_v9 }
  0xa7   :  { %v269_v4 = vsel %vm266_vm7, %v1339_v62, %v265_v5  ;;  %v275_v7 = vsel %vm266_vm7, %v265_v5, %v1671_v48  ;;  %v1426_v48 = vld [vmem:[%s2011_s5] sm:$0xff]  }
  0xa8   :  { %v294_v3 = vmul.f32 %v287_v52, %v269_v4  ;;  %v295_v22 = vmul.f32 %v291_v27, %v275_v7  ;;  %v437_v28 = vsel %vm426_vm4, %v219_v40, %v408_v42  ;;  %v438_v38 = vsel %vm426_vm4, %v399_v35, %v409_v2  ;;  %v456_v5 = vld [vmem:[%s2015_s4] sm:$0xff] }
  0xa9   :  { %v453_v62 = vpack.c.bf16 %v370_v18, %v370_v18  ;;  %v454_v19 = vpack.c.bf16 %v371_v54, %v371_v54  ;;  %v1435_v4 = vld [vmem:[%s2016_s6] sm:$0xff]  }
  0xaa   :  { %v441_v30 = vsel %vm426_vm4, %v294_v3, %v420_v25  ;;  %v442_v41 = vsel %vm426_vm4, %v295_v22, %v421_v29  ;;  %1275 = vmatprep.mubr.bf16.mxu1 %v1435_v4  ;;  %v1436_v4 = vld [vmem:[%s2016_s6 + $0x8] sm:$0xff]  }
  0xab   :  { %v449_v59 = vpack.c.bf16 %v441_v30, %v437_v28  ;;  %v450_v33 = vpack.c.bf16 %v442_v41, %v438_v38  ;;  %v474_v12 = vsel %vm466_vm9, %v453_v62, 0 }
  0xad   :  { %522 = vmatprep.subr.bf16.mxu0 %v450_v33 }
  0xae   :  { %523 = vmatpush1.bf16.msra.mxu0 %v449_v59 }
  0xaf   :  { %1187 = vmatprep.subr.msk.bf16.mxu0 %vm466_vm9, %v454_v19 }
  0xb2   :  { %525 = vmatpush1.bf16.msra.mxu0 %v474_v12 }
  0xb3   :  { %1241 = vmatprep.subr.bf16.mxu0 %v1426_v48 }
  0xb5   :  { %1188 = vmatmul.mubr.msk.bf16.vlgmr.msra.gmra.mrb[4].mxu0 %vm462_vm10, %v455_v0 }
  0xb6   :  { %1242 = vmatpush3.bf16.msra.mxu0 %v1426_v48  ;;  %1243 = vmatprep.mubr.msk.bf16.mxu0 %vm89_vm0, %v1427_v15 }
  0xbd   :  { %1244 = vmatmul.mubr.msk.bf16.vlgmr.msra.gmra.mrb[8].mxu0 %vm89_vm0, %v1428_v10 }
  0xbe   :  { %1247 = vmatprep.mubr.msk.bf16.mxu0 %vm89_vm0, %v1429_v55 }
  0xc5   :  { %1248 = vmatmul.mubr.msk.bf16.gmra.mrb[12].mxu0 %vm89_vm0, %v1430_v26 }
  0xc6   :  { %1251 = vmatprep.mubr.msk.bf16.mxu0 %vm89_vm0, %v1431_v36 }
  0xcd   :  { %1252 = vmatmul.mubr.msk.bf16.gmra.mrb[16].mxu0 %vm89_vm0, %v1432_v60 }
  0xce   :  { %1255 = vmatprep.mubr.msk.bf16.mxu0 %vm89_vm0, %v1433_v14 }
  0xd5   :  { %1256 = vmatmul.mubr.msk.bf16.gmra.mrb[20].mxu0 %vm89_vm0, %v1434_v20 }
 0x177   :  { %v1845_v40 = vpop.f32.mrb[0].mxu0 }
 0x178   :  { %v1847_v44 = vpop.f32.mrb[1].mxu0 }
 0x179   :  { %v517_v61 = vpop.f32.mrb[2].mxu0 }
 0x17a   :  { %v518_v31 = vpop.f32.mrb[3].mxu0 }
 0x188   :  { %v1849_v37 = vpop.f32.mrb[4].mxu0 }
 0x189   :  { %v1851_v49 = vpop.f32.mrb[5].mxu0 }
 0x18a   :  { %v558_v46 = vpop.f32.mrb[6].mxu0 }
 0x18b   :  { %v559_v47 = vpop.f32.mrb[7].mxu0 }
 0x190   :  { %v1245_v50 = vpop.f32.mrb[8].mxu0 }
 0x191   :  { %v683_v63 = vpop.f32.mrb[9].mxu0 }
 0x192   :  { %v1246_v13 = vpop.f32.mrb[10].mxu0 }
 0x193   :  { %v1390_v1 = vpack.i.bf16 %v1246_v13, %v1245_v50  ;;  %v686_v39 = vpop.f32.mrb[11].mxu0 }
 0x194   :  { %v1385_v45 = vpack.i.bf16 %v686_v39, %v683_v63 }
 0x198   :  { %v1853_v56 = vpop.f32.mrb[12].mxu0 }
 0x199   :  { %v1855_v51 = vpop.f32.mrb[13].mxu0 }
 0x19a   :  { %v1857_v8 = vpop.f32.mrb[14].mxu0 }
 0x19b   :  { %v1410_v11 = vpack.i.bf16 %v1857_v8, %v1853_v56  ;;  %v1861_v0 = vpop.f32.mrb[15].mxu0 }
 0x19c   :  { %v1405_v16 = vpack.i.bf16 %v1861_v0, %v1855_v51 }
 0x1a0   :  { %v1253_v53 = vpop.f32.mrb[16].mxu0 }
 0x1a1   :  { %v715_v57 = vpop.f32.mrb[17].mxu0 }
 0x1a2   :  { %v1254_v58 = vpop.f32.mrb[18].mxu0 }
 0x1a3   :  { %v1370_v32 = vpack.i.bf16 %v1254_v58, %v1253_v53  ;;  %v718_v17 = vpop.f32.mrb[19].mxu0 }
 0x1a4   :  { %v1365_v23 = vpack.i.bf16 %v718_v17, %v715_v57 }
 0x1a5   :  { %1351 = vrot.lane.b32.xlu1 %v1370_v32, %s1447_s29 }
 0x1a6   :  { %1346 = vrot.lane.b32.xlu0 %v1365_v23, %s1447_s29 }
 0x1a8   :  { %v1257_v24 = vpop.f32.mrb[20].mxu0 }
 0x1a9   :  { %v731_v52 = vpop.f32.mrb[21].mxu0 }
 0x1aa   :  { %v1258_v21 = vpop.f32.mrb[22].mxu0 }
 0x1ab   :  { %v1380_v27 = vpack.i.bf16 %v1258_v21, %v1257_v24  ;;  %v734_v42 = vpop.f32.mrb[23].mxu0 }
 0x1ac   :  { %v1375_v43 = vpack.i.bf16 %v734_v42, %v731_v52 }
 0x1ad   :  { %1361 = vrot.lane.b32.xlu1 %v1380_v27, %s1447_s29 }
 0x1ae   :  { %1356 = vrot.lane.b32.xlu0 %v1375_v43, %s1447_s29 }
 0x1b1   :  { %1371 = vrot.lane.b32.xlu1 %v1370_v32, %s1443_s26 }
 0x1b2   :  { %1366 = vrot.lane.b32.xlu0 %v1365_v23, %s1443_s26 }
 0x1b5   :  { %1381 = vrot.lane.b32.xlu1 %v1380_v27, %s1443_s26 }
 0x1b6   :  { %1376 = vrot.lane.b32.xlu0 %v1375_v43, %s1443_s26 }
 0x1ba   :  { %1386 = vrot.lane.b32.xlu0 %v1385_v45, %s1447_s29 }
 0x1be   :  { %1391 = vrot.lane.b32.xlu0 %v1390_v1, %s1447_s29 }
 0x1c2   :  { %1406 = vrot.lane.b32.xlu0 %v1405_v16, %s1447_s29 }
 0x1c6   :  { %1411 = vrot.lane.b32.xlu0 %v1410_v11, %s1447_s29 }
 0x1ca   :  { %459 = vperm.xlu0 %1425, %v456_v5  }
 0x217   :  { %v1352_v35 = vpop.permute.xlu1 %1351 }
 0x218   :  { %v1347_v2 = vpop.permute.xlu0 %1346 }
 0x219   :  { %1396 = vrot.lane.b32.xlu1 %v1347_v2, %s1443_s26 }
 0x21d   :  { %1401 = vrot.lane.b32.xlu1 %v1352_v35, %s1443_s26 }
 0x21f   :  { %v1362_v6 = vpop.permute.xlu1 %1361 }
 0x220   :  { %v1357_v34 = vpop.permute.xlu0 %1356 }
 0x221   :  { %1416 = vrot.lane.b32.xlu1 %v1357_v34, %s1443_s26 }
 0x223   :  { %v1372_v9 = vpop.permute.xlu1 %1371 }
 0x224   :  { %v1374_v7 = vunpack.i.h.bf16 %v1372_v9  ;;  %v1373_v25 = vunpack.i.l.bf16 %v1372_v9  ;;  %v1367_v3 = vpop.permute.xlu0 %1366 }
 0x225   :  { %v1369_v29 = vunpack.i.h.bf16 %v1367_v3  ;;  %v1368_v22 = vunpack.i.l.bf16 %v1367_v3  ;;  %1421 = vrot.lane.b32.xlu1 %v1362_v6, %s1443_s26  ;;  %v1439_v3 = vld [vmem:[%s2016_s6 + $0x20] sm:$0xff]  }
 0x226   :  { %v852_v28 = vsel %vm89_vm0, %v1245_v50, %v1373_v25  ;;  %v853_v18 = vsel %vm89_vm0, %v1246_v13, %v1374_v7  ;;  %v1437_v7 = vld [vmem:[%s2016_s6 + $0x10] sm:$0xff]   ;;  %v1438_v25 = vld [vmem:[%s2016_s6 + $0x18] sm:$0xff]  }
 0x227   :  { %v1382_v54 = vpop.permute.xlu1 %1381  ;;  %v850_v30 = vsel %vm89_vm0, %v683_v63, %v1368_v22  ;;  %v851_v38 = vsel %vm89_vm0, %v686_v39, %v1369_v29  ;;  %v867_v41 = vpack.c.bf16 %v853_v18, %v852_v28  ;;  %v1440_v29 = vld [vmem:[%s2016_s6 + $0x28] sm:$0xff]   ;;  %v1441_v22 = vld [vmem:[%s2016_s6 + $0x30] sm:$0xff]   ;;  %v1442_v28 = vld [vmem:[%s2016_s6 + $0x38] sm:$0xff]   ;;  %s1453_s6 = smov 48  }
 0x228   :  { %v1384_v59 = vunpack.i.h.bf16 %v1382_v54  ;;  %v1383_v33 = vunpack.i.l.bf16 %v1382_v54  ;;  %v1377_v62 = vpop.permute.xlu0 %1376  ;;  %v866_v19 = vpack.c.bf16 %v851_v38, %v850_v30 }
 0x229   :  { %v1379_v48 = vunpack.i.h.bf16 %v1377_v62  ;;  %v1378_v12 = vunpack.i.l.bf16 %v1377_v62 }
 0x22a   :  { %1259 = vmatprep.subr.bf16.mxu1 %v866_v19  ;;  %v856_v15 = vsel %vm89_vm0, %v1853_v56, %v1383_v33  ;;  %v857_v10 = vsel %vm89_vm0, %v1857_v8, %v1384_v59 }
 0x22b   :  { %1260 = vmatpush3.bf16.msra.mxu1 %v866_v19  ;;  %v854_v55 = vsel %vm89_vm0, %v1855_v51, %v1378_v12  ;;  %v855_v26 = vsel %vm89_vm0, %v1861_v0, %v1379_v48  ;;  %v869_v36 = vpack.c.bf16 %v857_v10, %v856_v15 }
 0x22c   :  { %1261 = vmatprep.subr.bf16.mxu1 %v867_v41  ;;  %v868_v60 = vpack.c.bf16 %v855_v26, %v854_v55  ;;  %v1387_v14 = vpop.permute.xlu0 %1386 }
 0x22d   :  { %v1389_v31 = vunpack.i.h.bf16 %v1387_v14  ;;  %v1388_v46 = vunpack.i.l.bf16 %v1387_v14 }
 0x22f   :  { %1262 = vmatpush3.bf16.msra.mxu1 %v867_v41 }
 0x230   :  { %1263 = vmatprep.subr.bf16.mxu1 %v868_v60  ;;  %v1392_v20 = vpop.permute.xlu0 %1391 }
 0x231   :  { %v1394_v56 = vunpack.i.h.bf16 %v1392_v20  ;;  %v1393_v51 = vunpack.i.l.bf16 %v1392_v20 }
 0x233   :  { %1264 = vmatpush3.bf16.msra.mxu1 %v868_v60 }
 0x234   :  { %1265 = vmatprep.subr.bf16.mxu1 %v869_v36  ;;  %v1407_v1 = vpop.permute.xlu0 %1406 }
 0x235   :  { %v1409_v58 = vunpack.i.h.bf16 %v1407_v1  ;;  %v1408_v32 = vunpack.i.l.bf16 %v1407_v1 }
 0x237   :  { %1266 = vmatpush3.bf16.msra.mxu1 %v869_v36 }
 0x238   :  { %v1412_v24 = vpop.permute.xlu0 %1411 }
 0x239   :  { %v1414_v43 = vunpack.i.h.bf16 %v1412_v24  ;;  %v1413_v5 = vunpack.i.l.bf16 %v1412_v24 }
 0x249   :  { %v1956_v60 = vpop.permute.xlu0 %459 }
 0x28b   :  { %v1397_v61 = vpop.permute.xlu1 %1396 }
 0x28c   :  { %v1399_v47 = vunpack.i.h.bf16 %v1397_v61  ;;  %v1398_v50 = vunpack.i.l.bf16 %v1397_v61 }
 0x28e   :  { %v858_v63 = vsel %vm89_vm0, %v1388_v46, %v1398_v50  ;;  %v859_v13 = vsel %vm89_vm0, %v1389_v31, %v1399_v47 }
 0x28f   :  { %v1402_v39 = vpop.permute.xlu1 %1401  ;;  %v870_v45 = vpack.c.bf16 %v859_v13, %v858_v63 }
 0x290   :  { %v1404_v8 = vunpack.i.h.bf16 %v1402_v39  ;;  %v1403_v11 = vunpack.i.l.bf16 %v1402_v39 }
 0x291   :  { %1267 = vmatprep.subr.bf16.mxu1 %v870_v45 }
 0x292   :  { %1268 = vmatpush3.bf16.msra.mxu1 %v870_v45  ;;  %v860_v0 = vsel %vm89_vm0, %v1393_v51, %v1403_v11  ;;  %v861_v16 = vsel %vm89_vm0, %v1394_v56, %v1404_v8 }
 0x293   :  { %v1417_v53 = vpop.permute.xlu1 %1416  ;;  %v871_v57 = vpack.c.bf16 %v861_v16, %v860_v0 }
 0x294   :  { %v1419_v17 = vunpack.i.h.bf16 %v1417_v53  ;;  %v1418_v23 = vunpack.i.l.bf16 %v1417_v53 }
 0x295   :  { %1269 = vmatprep.subr.bf16.mxu1 %v871_v57 }
 0x296   :  { %1270 = vmatpush3.bf16.msra.mxu1 %v871_v57  ;;  %v862_v52 = vsel %vm89_vm0, %v1408_v32, %v1418_v23  ;;  %v863_v21 = vsel %vm89_vm0, %v1409_v58, %v1419_v17 }
 0x297   :  { %v1422_v27 = vpop.permute.xlu1 %1421  ;;  %v872_v42 = vpack.c.bf16 %v863_v21, %v862_v52  ;;  %v514_v52 = vadd.f32 %v1845_v40, %v1956_v60  ;;  %v555_v40 = vadd.f32 %v1849_v37, %v1956_v60 }
 0x298   :  { %v1424_v35 = vunpack.i.h.bf16 %v1422_v27  ;;  %v1423_v2 = vunpack.i.l.bf16 %v1422_v27 }
 0x299   :  { %1271 = vmatprep.subr.bf16.mxu1 %v872_v42 }
 0x29a   :  { %1272 = vmatpush3.bf16.msra.mxu1 %v872_v42  ;;  %v864_v6 = vsel %vm89_vm0, %v1413_v5, %v1423_v2  ;;  %v865_v34 = vsel %vm89_vm0, %v1414_v43, %v1424_v35 }
 0x29b   :  { %v873_v9 = vpack.c.bf16 %v865_v34, %v864_v6 }
 0x29d   :  { %1273 = vmatprep.subr.bf16.mxu1 %v873_v9 }
 0x29e   :  { %1274 = vmatpush3.bf16.msra.mxu1 %v873_v9 }
 0x2a1   :  { %1276 = vmatmul.mubr.bf16.vlgmr.msra.gmra.mrb[0].mxu1 %v1436_v4 }
 0x2a2   :  { %1279 = vmatprep.mubr.bf16.mxu1 %v1437_v7 }
 0x2a9   :  { %1280 = vmatmul.mubr.bf16.gmra.mrb[4].mxu1 %v1438_v25 }
 0x2aa   :  { %1283 = vmatprep.mubr.bf16.mxu1 %v1439_v3 }
 0x2b1   :  { %1284 = vmatmul.mubr.bf16.gmra.mrb[8].mxu1 %v1440_v29 }
 0x2b2   :  { %1287 = vmatprep.mubr.bf16.mxu1 %v1441_v22 }
 0x2b9   :  { %1288 = vmatmul.mubr.bf16.gmra.mrb[12].mxu1 %v1442_v28 }
 0x374   :  { %v1277_v18 = vpop.f32.mrb[0].mxu1 }
 0x375   :  { %1040 = vrot.lane.b32.xlu0 %v1277_v18, %s1452_s12  ;;  %v1929_v54 = vpop.f32.mrb[1].mxu1 }
 0x376   :  { %v1278_v30 = vpop.f32.mrb[2].mxu1 }
 0x377   :  { %v1931_v38 = vpop.f32.mrb[3].mxu1 }
 0x378   :  { %1036 = vrot.lane.b32.xlu1 %v1931_v38, %s1443_s26 }
 0x379   :  { %1118 = vrot.lane.b32.xlu0 %v1277_v18, %s1443_s26 }
 0x37c   :  { %v1281_v41 = vpop.f32.mrb[4].mxu1 }
 0x37d   :  { %1115 = vrot.lane.b32.xlu0 %v1929_v54, %s1447_s29  ;;  %v988_v59 = vpop.f32.mrb[5].mxu1 }
 0x37e   :  { %v1282_v33 = vpop.f32.mrb[6].mxu1 }
 0x37f   :  { %v991_v62 = vpop.f32.mrb[7].mxu1 }
 0x381   :  { %1044 = vrot.lane.b32.xlu0 %v1278_v30, %s1453_s6 }
 0x384   :  { %v1285_v19 = vpop.f32.mrb[8].mxu1 }
 0x385   :  { %1121 = vrot.lane.b32.xlu0 %v1278_v30, %s1452_s12  ;;  %1068 = vrot.lane.b32.xlu1 %v1285_v19, %s1452_s12  ;;  %v1941_v48 = vpop.f32.mrb[9].mxu1 }
 0x386   :  { %v1286_v12 = vpop.f32.mrb[10].mxu1 }
 0x387   :  { %v1943_v15 = vpop.f32.mrb[11].mxu1 }
 0x389   :  { %1056 = vrot.lane.b32.xlu0 %v1281_v41, %s1454_s13  ;;  %1140 = vrot.lane.b32.xlu1 %v1285_v19, %s1443_s26 }
 0x38c   :  { %v1289_v10 = vpop.f32.mrb[12].mxu1 }
 0x38d   :  { %1130 = vrot.lane.b32.xlu0 %v1281_v41, %s1455_s14  ;;  %1137 = vrot.lane.b32.xlu1 %v1941_v48, %s1447_s29  ;;  %v1020_v55 = vpop.f32.mrb[13].mxu1 }
 0x38e   :  { %v1290_v26 = vpop.f32.mrb[14].mxu1 }
 0x38f   :  { %v1023_v36 = vpop.f32.mrb[15].mxu1 }
 0x391   :  { %1048 = vrot.lane.b32.xlu0 %v988_v59, %s1456_s15  ;;  %1072 = vrot.lane.b32.xlu1 %v1286_v12, %s1453_s6 }
 0x395   :  { %1124 = vrot.lane.b32.xlu0 %v988_v59, %s1453_s6  ;;  %1143 = vrot.lane.b32.xlu1 %v1286_v12, %s1452_s12  ;;  %v516_v59 = vadd.f32 %v1847_v44, %v1956_v60  ;;  %v557_v44 = vadd.f32 %v1851_v49, %v1956_v60 }
 0x399   :  { %1060 = vrot.lane.b32.xlu0 %v1282_v33, %s1447_s29  ;;  %1064 = vrot.lane.b32.xlu1 %v1943_v15, %s1443_s26 }
 0x39d   :  { %1052 = vrot.lane.b32.xlu0 %v991_v62, %s1455_s14  ;;  %1084 = vrot.lane.b32.xlu1 %v1289_v10, %s1454_s13 }
 0x3a1   :  { %1127 = vrot.lane.b32.xlu0 %v991_v62, %s1456_s15  ;;  %1152 = vrot.lane.b32.xlu1 %v1289_v10, %s1455_s14 }
 0x3a5   :  { %1133 = vrot.lane.b32.xlu0 %v1282_v33, %s1454_s13  ;;  %1076 = vrot.lane.b32.xlu1 %v1020_v55, %s1456_s15 }
 0x3a9   :  { %1146 = vrot.lane.b32.xlu1 %v1020_v55, %s1453_s6 }
 0x3ad   :  { %1088 = vrot.lane.b32.xlu1 %v1290_v26, %s1447_s29 }
 0x3b1   :  { %1080 = vrot.lane.b32.xlu1 %v1023_v36, %s1455_s14 }
 0x3b5   :  { %1149 = vrot.lane.b32.xlu1 %v1023_v36, %s1456_s15 }
 0x3b9   :  { %1155 = vrot.lane.b32.xlu1 %v1290_v26, %s1454_s13 }
 0x3e7   :  { %v1041_v14 = vpop.permute.xlu0 %1040 }
 0x3ea   :  { %v1037_v31 = vpop.permute.xlu1 %1036 }
 0x3eb   :  { %v1119_v20 = vpop.permute.xlu0 %1118  ;;  %v1091_v11 = vsel %vm89_vm0, %v1929_v54, %v1037_v31 }
 0x3ec   :  { %v1093_v53 = vsel %vm1092_vm11, %v1091_v11, %v1041_v14 }
 0x3ef   :  { %v1116_v61 = vpop.permute.xlu0 %1115 }
 0x3f0   :  { %v1158_v57 = vsel %vm89_vm0, %v1116_v61, %v1931_v38 }
 0x3f1   :  { %v1159_v21 = vsel %vm1092_vm11, %v1158_v57, %v1119_v20 }
 0x3f3   :  { %v1045_v46 = vpop.permute.xlu0 %1044 }
 0x3f4   :  { %v1095_v58 = vsel %vm1094_vm12, %v1093_v53, %v1045_v46 }
 0x3f7   :  { %v1122_v47 = vpop.permute.xlu0 %1121  ;;  %v1069_v50 = vpop.permute.xlu1 %1068 }
 0x3f8   :  { %v1160_v42 = vsel %vm1094_vm12, %v1159_v21, %v1122_v47 }
 0x3fb   :  { %v1057_v63 = vpop.permute.xlu0 %1056  ;;  %v1141_v13 = vpop.permute.xlu1 %1140 }
 0x3ff   :  { %v1131_v1 = vpop.permute.xlu0 %1130  ;;  %v1138_v39 = vpop.permute.xlu1 %1137 }
 0x400   :  { %v1165_v37 = vsel %vm89_vm0, %v1138_v39, %v1943_v15 }
 0x401   :  { %v1166_v33 = vsel %vm1092_vm11, %v1165_v37, %v1141_v13 }
 0x403   :  { %v1049_v45 = vpop.permute.xlu0 %1048  ;;  %v1073_v56 = vpop.permute.xlu1 %1072 }
 0x404   :  { %v1097_v32 = vsel %vm1096_vm13, %v1095_v58, %v1049_v45 }
 0x407   :  { %v1125_v51 = vpop.permute.xlu0 %1124  ;;  %v1144_v8 = vpop.permute.xlu1 %1143 }
 0x408   :  { %v1161_v5 = vsel %vm1096_vm13, %v1160_v42, %v1125_v51  ;;  %v1167_v19 = vsel %vm1094_vm12, %v1166_v33, %v1144_v8 }
 0x40b   :  { %v1061_v0 = vpop.permute.xlu0 %1060  ;;  %v1065_v16 = vpop.permute.xlu1 %1064 }
 0x40c   :  { %v1103_v22 = vsel %vm89_vm0, %v1941_v48, %v1065_v16 }
 0x40d   :  { %v1104_v28 = vsel %vm1092_vm11, %v1103_v22, %v1069_v50 }
 0x40e   :  { %v1105_v54 = vsel %vm1094_vm12, %v1104_v28, %v1073_v56 }
 0x40f   :  { %v1053_v17 = vpop.permute.xlu0 %1052  ;;  %v1085_v23 = vpop.permute.xlu1 %1084 }
 0x410   :  { %v1099_v24 = vsel %vm1098_vm14, %v1097_v32, %v1053_v17 }
 0x411   :  { %v1101_v27 = vsel %vm1100_vm15, %v1099_v24, %v1057_v63 }
 0x412   :  { %v1102_v43 = vsel %vm304_vm5, %v1101_v27, %v1061_v0 }
 0x413   :  { %v1110_v35 = vadd.f32 %v1102_v43, %v514_v52  ;;  %v1128_v2 = vpop.permute.xlu0 %1127  ;;  %v1153_v6 = vpop.permute.xlu1 %1152 }
 0x414   :  { %v1162_v34 = vsel %vm1098_vm14, %v1161_v5, %v1128_v2 }
 0x415   :  { %1112 = vst [vmem:[%s2017_s7] sm:$0xff] %v1110_v35  ;;  %v1163_v9 = vsel %vm1100_vm15, %v1162_v34, %v1131_v1 }
 0x417   :  { %v1134_v4 = vpop.permute.xlu0 %1133  ;;  %v1077_v7 = vpop.permute.xlu1 %1076 }
 0x418   :  { %v1164_v25 = vsel %vm304_vm5, %v1163_v9, %v1134_v4  ;;  %v1106_v30 = vsel %vm1096_vm13, %v1105_v54, %v1077_v7 }
 0x419   :  { %v1172_v3 = vadd.f32 %v1164_v25, %v555_v40 }
 0x41b   :  { %1214 = vst [vmem:[%s2017_s7 + $0x10] sm:$0xff] %v1172_v3  ;;  %v1147_v29 = vpop.permute.xlu1 %1146 }
 0x41c   :  { %v1168_v12 = vsel %vm1096_vm13, %v1167_v19, %v1147_v29 }
 0x41f   :  { %v1089_v18 = vpop.permute.xlu1 %1088 }
 0x423   :  { %v1081_v38 = vpop.permute.xlu1 %1080 }
 0x424   :  { %v1107_v41 = vsel %vm1098_vm14, %v1106_v30, %v1081_v38 }
 0x425   :  { %v1108_v62 = vsel %vm1100_vm15, %v1107_v41, %v1085_v23 }
 0x426   :  { %v1109_v48 = vsel %vm304_vm5, %v1108_v62, %v1089_v18 }
 0x427   :  { %v1111_v15 = vadd.f32 %v1109_v48, %v516_v59  ;;  %v1150_v10 = vpop.permute.xlu1 %1149 }
 0x428   :  { %v1169_v55 = vsel %vm1098_vm14, %v1168_v12, %v1150_v10 }
 0x429   :  { %1113 = vst [vmem:[%s2017_s7 + $0x8] sm:$0xff] %v1111_v15  ;;  %v1170_v26 = vsel %vm1100_vm15, %v1169_v55, %v1153_v6 }
 0x42b   :  { %v1156_v36 = vpop.permute.xlu1 %1155 }
 0x42c   :  { %v1171_v14 = vsel %vm304_vm5, %v1170_v26, %v1156_v36 }
 0x42d   :  { %v1173_v20 = vadd.f32 %v1171_v14, %v557_v44 }
 0x42f   :  { %1215 = vst [vmem:[%s2017_s7 + $0x18] sm:$0xff] %v1173_v20 }

</bundles_post_ra>
